<compile_context>
chip_gen: v7x
topology: tpu7x:2x2x1
jax: 0.10.0
libtpu: 0.0.40
codegen_flags: <defaults>
</compile_context>

<pallas_src>
import jax
import jax.numpy as jnp
from jax.experimental import pallas as pl
from jax.experimental.pallas import tpu as pltpu


# ----------------------------------------------------------------------------
# Kernel
# ----------------------------------------------------------------------------
def metanet_kernel(emb_ref, mask_ref, w1_ref, b1_ref, w2_ref,
                   wd1_ref, bd1_ref, wd2_ref, bd2_ref, out_ref):
    tb, sl, d = emb_ref.shape
    x = emb_ref[...].astype(jnp.float32)                         # (TB, SL, D)

    # --- event_K scorer: Linear(D,D) -> ReLU -> Linear(D,1, no bias) --------
    # One tall (TB*SL, D) x (D, D) MXU matmul instead of TB tiny matmuls.
    # (sl is padded to a multiple of 8 by the wrapper, so this reshape is a
    #  layout no-op.)
    x2d = x.reshape(tb * sl, d)
    h = jnp.dot(x2d, w1_ref[...], preferred_element_type=jnp.float32)
    h = jnp.maximum(h + b1_ref[...], 0.0)                        # (TB*SL, D)
    # Final Linear(D, 1): multiply + lane reduce (avoids a 1-column matmul).
    k = jnp.sum(h.reshape(tb, sl, d) * w2_ref[...][None], axis=-1)   # (TB, SL)

    # --- masked softmax over the sequence axis (lane-dense 2-D) -------------
    # Single select; identical to k - (1-mask)*1e8 for a {0,1} mask.
    t = jnp.where(mask_ref[...] != 0, k, k - 1e8)                # (TB, SL)
    t_max = jnp.max(t, axis=-1, keepdims=True)
    e = jnp.exp(t - t_max)
    att = e / jnp.sum(e, axis=-1, keepdims=True)                 # (TB, SL)

    # --- attention-weighted pooling: his = sum_s att * emb -------------------
    his = jnp.sum(att[:, :, None] * x, axis=1)                   # (TB, D)

    # --- decoder: Linear(D, M) -> ReLU -> Linear(M, D*D) --------------------
    h2 = jnp.dot(his, wd1_ref[...], preferred_element_type=jnp.float32)
    h2 = jnp.maximum(h2 + bd1_ref[...], 0.0)                     # (TB, M)
    out = jnp.dot(h2, wd2_ref[...], preferred_element_type=jnp.float32)
    out_ref[...] = (out + bd2_ref[...]).astype(out_ref.dtype)    # (TB, D*D)


# ----------------------------------------------------------------------------
# Tiling / VMEM budgeting
# ----------------------------------------------------------------------------
def _vmem_capacity_bytes():
    """Per-core VMEM capacity; fall back to the most restrictive (v7x)."""
    try:
        return int(pltpu.get_tpu_info().vmem_capacity_bytes)
    except Exception:
        return 64 * 1024 * 1024


def _pick_tiling(bs, sl, d, m_dim, io_bytes):
    """Pick (batch_tile, vmem_limit_bytes).

    batch_tile is a multiple of 8, sized so that the double-buffered streamed
    blocks + f32 temporaries + (double-buffered) resident weights fit inside a
    per-generation VMEM budget, while still leaving >= 4 grid steps when the
    batch allows (>= 2 per TensorCore on v7x, >= 3 pipelined steps on v5e/v6e).
    """
    vmem_cap = _vmem_capacity_bytes()
    vmem_limit = min(int(vmem_cap * 3) // 4, 96 * 1024 * 1024)

    # Weights are grid-constant but still (conservatively) double-buffered.
    weight_elems = (d * d + d + d          # w1, b1, w2
                    + d * m_dim + m_dim    # wd1, bd1
                    + m_dim * d * d + d * d)   # wd2, bd2
    weight_bytes = 2 * 4 * weight_elems

    budget = vmem_limit - weight_bytes - (4 << 20)   # compiler-scratch margin
    budget = max(budget, 4 << 20)

    # Per-batch-row bytes: double-buffered streamed blocks (emb, mask, out at
    # io width) + single-buffered f32 temporaries (x cast, h, f32 out, his,
    # h2, and the small (sl,) score tensors).
    stream_row = 2 * io_bytes * (sl * d + sl + d * d)
    temp_row = 4 * (2 * sl * d + d * d + d + m_dim + 4 * sl)
    per_row = stream_row + temp_row

    cap = max(8, (budget // per_row) // 8 * 8)

    # Target >= 4 grid steps (round the per-step rows up to a sublane multiple).
    want = -(-bs // 4)
    want = max(8, -(-want // 8) * 8)

    tb = max(8, min(cap, want) // 8 * 8)
    return tb, vmem_limit


# ----------------------------------------------------------------------------
# pallas_call builder + wrapper
# ----------------------------------------------------------------------------
def _build_metanet_call(bs, sl, d, m_dim, tb, io_dtype, vmem_limit):
    def wspec(shape):
        nd = len(shape)
        return pl.BlockSpec(shape, lambda i, _nd=nd: (0,) * _nd)

    cost = pl.CostEstimate(
        flops=2 * bs * (sl * d * d + 2 * sl * d + d * m_dim + m_dim * d * d),
        transcendentals=bs * sl,
        bytes_accessed=(jnp.dtype(io_dtype).itemsize
                        * (bs * sl * d + bs * sl + bs * d * d)
                        + 4 * (2 * d * d + 2 * d + d * m_dim + m_dim
                               + m_dim * d * d)),
    )

    return pl.pallas_call(
        metanet_kernel,
        out_shape=jax.ShapeDtypeStruct((bs, d * d), io_dtype),
        grid_spec=pltpu.PrefetchScalarGridSpec(
            num_scalar_prefetch=0,
            grid=(bs // tb,),
            in_specs=[
                pl.BlockSpec((tb, sl, d), lambda i: (i, 0, 0)),   # emb_fea
                pl.BlockSpec((tb, sl), lambda i: (i, 0)),         # mask
                wspec((d, d)),          # event_K W1 (pre-transposed: in x out)
                wspec((1, d)),          # event_K b1
                wspec((1, d)),          # event_K W2 (Linear(D,1), no bias)
                wspec((d, m_dim)),      # decoder W1
                wspec((1, m_dim)),      # decoder b1
                wspec((m_dim, d * d)),  # decoder W2
                wspec((1, d * d)),      # decoder b2
            ],
            out_specs=pl.BlockSpec((tb, d * d), lambda i: (i, 0)),
        ),
        compiler_params=pltpu.CompilerParams(
            dimension_semantics=("parallel",),
            vmem_limit_bytes=int(vmem_limit),
        ),
        cost_estimate=cost,
    )


def metanet_forward(emb_fea, mask, params, *, io_dtype=jnp.float32,
                    batch_tile=None):
    """emb_fea: (bs, sl, d) ; mask: (bs, sl) with 1.0 = valid position.

    io_dtype: dtype used for the streamed tensors (emb, mask, output).  Use
    jnp.bfloat16 to halve HBM traffic; all arithmetic stays f32.
    """
    bs, sl, d = emb_fea.shape
    m_dim = params["wd1"].shape[1]
    io_bytes = jnp.dtype(io_dtype).itemsize

    # Pad sl to a sublane multiple so in-kernel reshapes are layout no-ops.
    sl_pad = -(-sl // 8) * 8

    tb, vmem_limit = _pick_tiling(bs, sl_pad, d, m_dim, io_bytes)
    if batch_tile is not None:
        assert batch_tile % 8 == 0, "batch_tile must be a multiple of 8"
        tb = batch_tile

    # Pad batch to a multiple of the tile (padding sliced off the output).
    bs_pad = -(-bs // tb) * tb

    emb = emb_fea.astype(io_dtype)
    msk = mask.astype(io_dtype)
    if bs_pad != bs or sl_pad != sl:
        emb = jnp.pad(emb, ((0, bs_pad - bs), (0, sl_pad - sl), (0, 0)))
        msk = jnp.pad(msk, ((0, bs_pad - bs), (0, sl_pad - sl)))

    call = _build_metanet_call(bs_pad, sl_pad, d, m_dim, tb, io_dtype,
                               vmem_limit)
    out_flat = call(emb, msk,
                    params["w1"], params["b1"], params["w2"],
                    params["wd1"], params["bd1"], params["wd2"], params["bd2"])
    return out_flat[:bs].reshape(bs, d, d)


# ----------------------------------------------------------------------------
# Pure-JAX reference + params
# ----------------------------------------------------------------------------
def metanet_reference(emb_fea, mask, params):
    """Pure-JAX mirror of the PyTorch forward, for validation."""
    d = emb_fea.shape[-1]
    m = 1.0 - mask                                                 # (bs, sl)
    h = jnp.maximum(emb_fea @ params["w1"] + params["b1"][0], 0.0)
    k = jnp.sum(h * params["w2"][0], axis=-1, keepdims=True)       # (bs, sl, 1)
    t = k - m[:, :, None] * 1e8
    att = jax.nn.softmax(t, axis=1)
    his = jnp.sum(att * emb_fea, axis=1)                           # (bs, d)
    h2 = jnp.maximum(his @ params["wd1"] + params["bd1"][0], 0.0)
    out = h2 @ params["wd2"] + params["bd2"][0]
    return out.reshape(-1, d, d)


def init_params(key, emb_dim, meta_dim):
    ks = jax.random.split(key, 7)
    scale = 0.1
    return {
        "w1":  scale * jax.random.normal(ks[0], (emb_dim, emb_dim), jnp.float32),
        "b1":  scale * jax.random.normal(ks[1], (1, emb_dim), jnp.float32),
        "w2":  scale * jax.random.normal(ks[2], (1, emb_dim), jnp.float32),
        "wd1": scale * jax.random.normal(ks[3], (emb_dim, meta_dim), jnp.float32),
        "bd1": scale * jax.random.normal(ks[4], (1, meta_dim), jnp.float32),
        "wd2": scale * jax.random.normal(ks[5], (meta_dim, emb_dim * emb_dim), jnp.float32),
        "bd2": scale * jax.random.normal(ks[6], (1, emb_dim * emb_dim), jnp.float32),
    }


if __name__ == "__main__":
    bs, sl, emb_dim, meta_dim = 64, 8, 32, 16

    key = jax.random.PRNGKey(0)
    k_emb, k_mask, k_par = jax.random.split(key, 3)

    emb_fea = jax.random.normal(k_emb, (bs, sl, emb_dim), jnp.float32)
    # mask == 1.0 -> valid position, mask == 0.0 -> masked out (torch usage)
    mask = (jax.random.uniform(k_mask, (bs, sl)) < 0.7).astype(jnp.float32)
    mask = mask.at[:, 0].set(1.0)     # guarantee >= 1 valid position per row

    params = init_params(k_par, emb_dim, meta_dim)
    ref = metanet_reference(emb_fea, mask, params)

    # Default f32 I/O path: bit-comparable with the reference.
    out = metanet_forward(emb_fea, mask, params)
    out = jax.block_until_ready(out)
    assert out.shape == (bs, emb_dim, emb_dim)
    assert jnp.allclose(out, ref, atol=1e-4, rtol=1e-4), "f32 mismatch vs reference"

    # Opt-in bf16 I/O path (halves HBM traffic; f32 accumulation inside).
    out_bf16 = metanet_forward(emb_fea, mask, params, io_dtype=jnp.bfloat16)
    out_bf16 = jax.block_until_ready(out_bf16)
    assert out_bf16.shape == (bs, emb_dim, emb_dim)
    assert out_bf16.dtype == jnp.bfloat16
    assert jnp.allclose(out_bf16.astype(jnp.float32), ref, atol=1e-1, rtol=1e-1), \
        "bf16 mismatch vs reference"

    print("KERNEL_OK")
</pallas_src>

<mosaic_0001>
module attributes {stable_mosaic.version = 11 : i64} {
  func.func @metanet_kernel(%arg0: i32, %arg1: memref<16x8x32xf32, #tpu.memory_space<vmem>>, %arg2: memref<16x8xf32, #tpu.memory_space<vmem>>, %arg3: memref<32x32xf32, #tpu.memory_space<vmem>>, %arg4: memref<1x32xf32, #tpu.memory_space<vmem>>, %arg5: memref<1x32xf32, #tpu.memory_space<vmem>>, %arg6: memref<32x16xf32, #tpu.memory_space<vmem>>, %arg7: memref<1x16xf32, #tpu.memory_space<vmem>>, %arg8: memref<16x1024xf32, #tpu.memory_space<vmem>>, %arg9: memref<1x1024xf32, #tpu.memory_space<vmem>>, %arg10: memref<16x1024xf32, #tpu.memory_space<vmem>>) attributes {dimension_semantics = [#tpu.dimension_semantics<parallel>], iteration_bounds = array<i64: 4>, scalar_prefetch = 0 : i64, scratch_operands = 0 : i64, tpu.core_type = #tpu.core_type<tc>, window_params = [{transform_indices = @transform_0, window_bounds = array<i64: 16, 8, 32>}, {transform_indices = @transform_1, window_bounds = array<i64: 16, 8>}, {pipeline_mode = #tpu.pipeline_mode<synchronous>, transform_indices = @transform_2, window_bounds = array<i64: 32, 32>}, {pipeline_mode = #tpu.pipeline_mode<synchronous>, transform_indices = @transform_3, window_bounds = array<i64: 1, 32>}, {pipeline_mode = #tpu.pipeline_mode<synchronous>, transform_indices = @transform_4, window_bounds = array<i64: 1, 32>}, {pipeline_mode = #tpu.pipeline_mode<synchronous>, transform_indices = @transform_5, window_bounds = array<i64: 32, 16>}, {pipeline_mode = #tpu.pipeline_mode<synchronous>, transform_indices = @transform_6, window_bounds = array<i64: 1, 16>}, {pipeline_mode = #tpu.pipeline_mode<synchronous>, transform_indices = @transform_7, window_bounds = array<i64: 16, 1024>}, {pipeline_mode = #tpu.pipeline_mode<synchronous>, transform_indices = @transform_8, window_bounds = array<i64: 1, 1024>}, {transform_indices = @transform_9, window_bounds = array<i64: 16, 1024>}]} {
    %c0 = arith.constant 0 : index
    %c0_0 = arith.constant 0 : index
    %c0_1 = arith.constant 0 : index
    %0 = vector.load %arg1[%c0, %c0_0, %c0_1] : memref<16x8x32xf32, #tpu.memory_space<vmem>>, vector<16x8x32xf32>
    %1 = vector.shape_cast %0 : vector<16x8x32xf32> to vector<128x32xf32>
    %c0_2 = arith.constant 0 : index
    %c0_3 = arith.constant 0 : index
    %2 = vector.load %arg3[%c0_2, %c0_3] : memref<32x32xf32, #tpu.memory_space<vmem>>, vector<32x32xf32>
    %cst = arith.constant dense<0.000000e+00> : vector<128x32xf32>
    %3 = tpu.matmul %1, %2, %cst {dimension_numbers = #tpu.dot_dimension_numbers<[1], [0], [0], [1], [0, 0, 1, 1], [], []>} : vector<128x32xf32>, vector<32x32xf32>, vector<128x32xf32> -> vector<128x32xf32>
    %c0_4 = arith.constant 0 : index
    %c0_5 = arith.constant 0 : index
    %4 = vector.load %arg4[%c0_4, %c0_5] : memref<1x32xf32, #tpu.memory_space<vmem>>, vector<1x32xf32>
    %5 = vector.broadcast %4 : vector<1x32xf32> to vector<128x32xf32>
    %6 = arith.addf %3, %5 : vector<128x32xf32>
    %cst_6 = arith.constant 0.000000e+00 : f32
    %7 = vector.broadcast %cst_6 : f32 to vector<128x32xf32>
    %8 = arith.maximumf %6, %7 : vector<128x32xf32>
    %9 = vector.shape_cast %8 : vector<128x32xf32> to vector<16x8x32xf32>
    %c0_7 = arith.constant 0 : index
    %c0_8 = arith.constant 0 : index
    %10 = vector.load %arg5[%c0_7, %c0_8] : memref<1x32xf32, #tpu.memory_space<vmem>>, vector<1x32xf32>
    %11 = vector.shape_cast %10 : vector<1x32xf32> to vector<1x1x32xf32>
    %12 = vector.broadcast %11 : vector<1x1x32xf32> to vector<16x8x32xf32>
    %13 = arith.mulf %9, %12 : vector<16x8x32xf32>
    %cst_9 = arith.constant dense<0.000000e+00> : vector<16x8xf32>
    %14 = vector.multi_reduction <add>, %13, %cst_9 [2] : vector<16x8x32xf32> to vector<16x8xf32>
    %c0_10 = arith.constant 0 : index
    %c0_11 = arith.constant 0 : index
    %15 = vector.load %arg2[%c0_10, %c0_11] : memref<16x8xf32, #tpu.memory_space<vmem>>, vector<16x8xf32>
    %cst_12 = arith.constant 0.000000e+00 : f32
    %16 = vector.broadcast %cst_12 : f32 to vector<16x8xf32>
    %17 = arith.cmpf one, %15, %16 : vector<16x8xf32>
    %cst_13 = arith.constant 1.000000e+08 : f32
    %18 = vector.broadcast %cst_13 : f32 to vector<16x8xf32>
    %19 = arith.subf %14, %18 : vector<16x8xf32>
    %20 = arith.select %17, %14, %19 : vector<16x8xi1>, vector<16x8xf32>
    %cst_14 = arith.constant dense<0xFF800000> : vector<16xf32>
    %21 = vector.multi_reduction <maximumf>, %20, %cst_14 [1] : vector<16x8xf32> to vector<16xf32>
    %22 = vector.shape_cast %21 : vector<16xf32> to vector<16x1xf32>
    %23 = vector.broadcast %22 : vector<16x1xf32> to vector<16x8xf32>
    %24 = arith.subf %20, %23 : vector<16x8xf32>
    %25 = math.exp %24 : vector<16x8xf32>
    %cst_15 = arith.constant dense<0.000000e+00> : vector<16xf32>
    %26 = vector.multi_reduction <add>, %25, %cst_15 [1] : vector<16x8xf32> to vector<16xf32>
    %27 = vector.shape_cast %26 : vector<16xf32> to vector<16x1xf32>
    %28 = vector.broadcast %27 : vector<16x1xf32> to vector<16x8xf32>
    %29 = arith.divf %25, %28 : vector<16x8xf32>
    %30 = vector.shape_cast %29 : vector<16x8xf32> to vector<16x8x1xf32>
    %31 = vector.broadcast %30 : vector<16x8x1xf32> to vector<16x8x32xf32>
    %32 = arith.mulf %31, %0 : vector<16x8x32xf32>
    %cst_16 = arith.constant dense<0.000000e+00> : vector<16x32xf32>
    %33 = vector.multi_reduction <add>, %32, %cst_16 [1] : vector<16x8x32xf32> to vector<16x32xf32>
    %c0_17 = arith.constant 0 : index
    %c0_18 = arith.constant 0 : index
    %34 = vector.load %arg6[%c0_17, %c0_18] : memref<32x16xf32, #tpu.memory_space<vmem>>, vector<32x16xf32>
    %cst_19 = arith.constant dense<0.000000e+00> : vector<16x16xf32>
    %35 = tpu.matmul %33, %34, %cst_19 {dimension_numbers = #tpu.dot_dimension_numbers<[1], [0], [0], [1], [0, 0, 1, 1], [], []>} : vector<16x32xf32>, vector<32x16xf32>, vector<16x16xf32> -> vector<16x16xf32>
    %c0_20 = arith.constant 0 : index
    %c0_21 = arith.constant 0 : index
    %36 = vector.load %arg7[%c0_20, %c0_21] : memref<1x16xf32, #tpu.memory_space<vmem>>, vector<1x16xf32>
    %37 = vector.broadcast %36 : vector<1x16xf32> to vector<16x16xf32>
    %38 = arith.addf %35, %37 : vector<16x16xf32>
    %cst_22 = arith.constant 0.000000e+00 : f32
    %39 = vector.broadcast %cst_22 : f32 to vector<16x16xf32>
    %40 = arith.maximumf %38, %39 : vector<16x16xf32>
    %c0_23 = arith.constant 0 : index
    %c0_24 = arith.constant 0 : index
    %41 = vector.load %arg8[%c0_23, %c0_24] : memref<16x1024xf32, #tpu.memory_space<vmem>>, vector<16x1024xf32>
    %cst_25 = arith.constant dense<0.000000e+00> : vector<16x1024xf32>
    %42 = tpu.matmul %40, %41, %cst_25 {dimension_numbers = #tpu.dot_dimension_numbers<[1], [0], [0], [1], [0, 0, 1, 1], [], []>} : vector<16x16xf32>, vector<16x1024xf32>, vector<16x1024xf32> -> vector<16x1024xf32>
    %c0_26 = arith.constant 0 : index
    %c0_27 = arith.constant 0 : index
    %43 = vector.load %arg9[%c0_26, %c0_27] : memref<1x1024xf32, #tpu.memory_space<vmem>>, vector<1x1024xf32>
    %44 = vector.broadcast %43 : vector<1x1024xf32> to vector<16x1024xf32>
    %45 = arith.addf %42, %44 : vector<16x1024xf32>
    %c0_28 = arith.constant 0 : index
    %c0_29 = arith.constant 0 : index
    %46 = vector.load %arg10[%c0_28, %c0_29] : memref<16x1024xf32, #tpu.memory_space<vmem>>, vector<16x1024xf32>
    tpu.vector_store %arg10[%c0_28, %c0_29], %45 {strides = array<i32>} : memref<16x1024xf32, #tpu.memory_space<vmem>>, vector<16x1024xf32>,
    return
  }
  func.func @transform_0(%arg0: i32) -> (i32, i32, i32) {
    %c0_i32 = arith.constant 0 : i32
    %c0_i32_0 = arith.constant 0 : i32
    %c0_i32_1 = arith.constant 0 : i32
    return %arg0, %c0_i32, %c0_i32_0 : i32, i32, i32
  }
  func.func @transform_1(%arg0: i32) -> (i32, i32) {
    %c0_i32 = arith.constant 0 : i32
    %c0_i32_0 = arith.constant 0 : i32
    return %arg0, %c0_i32 : i32, i32
  }
  func.func @transform_2(%arg0: i32) -> (i32, i32) {
    %c0_i32 = arith.constant 0 : i32
    %c0_i32_0 = arith.constant 0 : i32
    %c0_i32_1 = arith.constant 0 : i32
    return %c0_i32, %c0_i32_0 : i32, i32
  }
  func.func @transform_3(%arg0: i32) -> (i32, i32) {
    %c0_i32 = arith.constant 0 : i32
    %c0_i32_0 = arith.constant 0 : i32
    %c0_i32_1 = arith.constant 0 : i32
    return %c0_i32, %c0_i32_0 : i32, i32
  }
  func.func @transform_4(%arg0: i32) -> (i32, i32) {
    %c0_i32 = arith.constant 0 : i32
    %c0_i32_0 = arith.constant 0 : i32
    %c0_i32_1 = arith.constant 0 : i32
    return %c0_i32, %c0_i32_0 : i32, i32
  }
  func.func @transform_5(%arg0: i32) -> (i32, i32) {
    %c0_i32 = arith.constant 0 : i32
    %c0_i32_0 = arith.constant 0 : i32
    %c0_i32_1 = arith.constant 0 : i32
    return %c0_i32, %c0_i32_0 : i32, i32
  }
  func.func @transform_6(%arg0: i32) -> (i32, i32) {
    %c0_i32 = arith.constant 0 : i32
    %c0_i32_0 = arith.constant 0 : i32
    %c0_i32_1 = arith.constant 0 : i32
    return %c0_i32, %c0_i32_0 : i32, i32
  }
  func.func @transform_7(%arg0: i32) -> (i32, i32) {
    %c0_i32 = arith.constant 0 : i32
    %c0_i32_0 = arith.constant 0 : i32
    %c0_i32_1 = arith.constant 0 : i32
    return %c0_i32, %c0_i32_0 : i32, i32
  }
  func.func @transform_8(%arg0: i32) -> (i32, i32) {
    %c0_i32 = arith.constant 0 : i32
    %c0_i32_0 = arith.constant 0 : i32
    %c0_i32_1 = arith.constant 0 : i32
    return %c0_i32, %c0_i32_0 : i32, i32
  }
  func.func @transform_9(%arg0: i32) -> (i32, i32) {
    %c0_i32 = arith.constant 0 : i32
    %c0_i32_0 = arith.constant 0 : i32
    return %arg0, %c0_i32 : i32, i32
  }
}

</mosaic_0001>

<bundles_post_ra>
// kernel: tpu_custom_call.1
= control target key start
LH: loop header
LB: loop body
LE: loop exit
PB: predicated region body
PF: predicated region fallthrough
CT: control target
= control target key end

     0   :  { %14 = vsyncpa [#allocation3], 0  ;;  %s2620_s0 = inlined_call_operand.vmem [shape: f32[64,8,32], index: 0, kind: input, shape index: {}]   ;;  %s2621_s1 = inlined_call_operand.vmem [shape: f32[64,8], index: 1, kind: input, shape index: {}]   ;;  %s2622_s2 = inlined_call_operand.vmem [shape: f32[32,32], index: 2, kind: input, shape index: {}]   ;;  %s2623_s3 = inlined_call_operand.vmem [shape: f32[1,32], index: 3, kind: input, shape index: {}]   ;;  %s2624_s4 = inlined_call_operand.vmem [shape: f32[1,32], index: 4, kind: input, shape index: {}]   ;;  %s2625_s5 = inlined_call_operand.vmem [shape: f32[32,16], index: 5, kind: input, shape index: {}]   ;;  %s2626_s6 = inlined_call_operand.vmem [shape: f32[1,16], index: 6, kind: input, shape index: {}]   ;;  %s2627_s7 = inlined_call_operand.vmem [shape: f32[16,1024], index: 7, kind: input, shape index: {}]   ;;  %s2628_s8 = inlined_call_operand.vmem [shape: f32[1,1024], index: 8, kind: input, shape index: {}]   ;;  %s2629_s9 = inlined_call_operand.hbm [shape: f32[64,1024], index: 9, kind: output, shape index: {}]  }
   0x1   :  { %16 = vsyncpa [#allocation3 + $0x1], 0  ;;  %s2081_s30 = smov 0   ;;  %s2083_s10 = smov 0  }
   0x2   :  { %s2085_s11 = smov 0   ;;  %s2087_s12 = smov 0  }
   0x3 LB: > { %s2102_s13 = sadd.s32 4294967295, %s2025_s12   ;;  %s1750_s14 = sadd.s32 4294967294, %s2025_s12   ;;  %s2025_s12 = sphi %s2087_s12, %s2635_s12   ;;  %s2021_s11 = sphi %s2085_s11, %s2634_s11   ;;  %s2017_s10 = sphi %s2083_s10, %s2633_s10   ;;  %s2013_s30 = sphi %s2081_s30, %s2632_s30  }
   0x4   : > { %s2106_s15 = sadd.s32 1, %s2025_s12   ;;  %s228_s16 = sadd.s32 1, %s2021_s11 }
   0x5   : > { %s225_s17 = ssub.s32 %s2025_s12, %s2106_s15  ;;  %p238_p0 = scmp.ne.s32.totalorder %s2021_s11, %s2017_s10 }
   0x6   : > { %p226_p1 = scmp.eq.s32.totalorder %s225_s17, 0  ;;  %p239_p2 = scmp.eq.s32.totalorder %s2102_s13, 3 }
   0x7   : > { %p244_p3 = scmp.ne.s32.totalorder %s2017_s10, %s2013_s30  ;;  %p245_p4 = scmp.eq.s32.totalorder %s1750_s14, 3 }
   0x8   : > { %s2117_s18 = scalar_select %p226_p1, %s2021_s11, %s228_s16  }
   0x9   : > { %p2119_p5 = por %p239_p2, %p238_p0  ;;  %p2123_p6 = por %p245_p4, %p244_p3 }
   0xa   : > { %p1753_p7 = scmp.ge.s32.totalorder %s2025_s12, 1  ;;  %p302_p8 = scmp.lt.s32.totalorder %s2025_s12, 5 }
   0xc   : > { %p303_p9 = pnand %p1753_p7, %p302_p8 }
   0xd   : > { %v372_v0 = vld [vmem:[%s2622_s2] sm:$0xff] (!%p303_p9)  ;;  %v373_v1 = vld [vmem:[%s2622_s2 + $0x8] sm:$0xff] (!%p303_p9)  ;;  %v374_v2 = vld [vmem:[%s2622_s2 + $0x10] sm:$0xff] (!%p303_p9)  ;;  %s1755_s27 = sshll.u32 (!%p303_p9), %s2102_s13, 4  ;;  %vm383_vm0 = vcmask (!%p303_p9), 261120   ;;  %s1757_s26 = sshll.u32 (!%p303_p9), %s2102_s13, 1 }
   0xe   : > { %306 = sbr.rel (%p303_p9) target bundleno = 1375 (0x55f), region = 56  ;;  %v1881_v3 = vpack.c.bf16 (!%p303_p9), %v373_v1, %v372_v0  ;;  %v375_v4 = vld [vmem:[%s2622_s2 + $0x18] sm:$0xff] (!%p303_p9)  ;;  %p344_p10 = scmp.lt.s32.totalorder (!%p303_p9), %s1755_s27, 63  ;;  %v2230_v22 = vld [vmem:[%s2623_s3] ss:$0 sm:$0xff] (!%p303_p9)  ;;  %vm766_vm1 = vcmask (!%p303_p9), 1041409  }
   0xf   : > { %v1885_v5 = vpack.c.bf16 (!%p303_p9), %v375_v4, %v374_v2  ;;  %v2237_v27 = vld [vmem:[%s2624_s4] ss:$0 sm:$0xff] (!%p303_p9)  ;;  %p350_p11 = scmp.lt.s32.totalorder (!%p303_p9), %s1757_s26, 7  ;;  %vm768_vm2 = vcmask (!%p303_p9), 1042434   ;;  %vm770_vm3 = vcmask (!%p303_p9), 1043459   ;;  %vm772_vm4 = vcmask (!%p303_p9), 1044484  }
  0x10   : > { %1882 = vmatprep.subr.bf16.mxu0 (!%p303_p9), %v1881_v3  ;;  %vm774_vm5 = vcmask (!%p303_p9), 1045509   ;;  %vm776_vm6 = vcmask (!%p303_p9), 1046534   ;;  %vm778_vm8 = vcmask (!%p303_p9), 1047559   ;;  %vm887_vm9 = vcmask (!%p303_p9), 64512   ;;  %s340_s25 = sand.u32 (!%p303_p9), 1, %s2017_s10   ;;  %s2028_s24 = smov (!%p303_p9), [#allocation2]  }
  0x11   : > { %1884 = vmatpush3.bf16.msra.mxu0 (!%p303_p9), %v1881_v3  ;;  %vm1330_vm11 = vcmask (!%p303_p9), 130048   ;;  %s1754_s28 = sshll.u32 (!%p303_p9), %s340_s25, 7 }
  0x12   : > { %1886 = vmatprep.subr.bf16.mxu0 (!%p303_p9), %v1885_v5  ;;  %s2544_s29 = scalar_lea.vmem (!%p303_p9), [#allocation2], %s1754_s28 }
  0x13   : > { %s1676_s16 = sshll.u32 (!%p303_p9), %s2544_s29, 4  ;;  %s2573_s16 = int_to_ptr.vmem [resolvable:$true] %s1676_s16 }
  0x14   : > { %s1963_s23 = scalar_lea.vmem (!%p303_p9), %s2573_s16, 2048 }
  0x15   : > { %s2637_s27 = smov (!%p344_p10, %s1755_s27), 63  ;;  %1888 = vmatpush3.bf16.msra.mxu0 %v1885_v5  ;;  %s2639_s26 = smov (!%p350_p11, %s1757_s26), 7 }
  0x16   : > { %s1756_s14 = sshll.u32 %s2637_s27, 3  ;;  %s1758_s27 = sshll.u32 %s2639_s26, 3 }
  0x17   : > { %s2145_s21 = scalar_lea.vmem %s2620_s0, %s1756_s14  ;;  %s2317_s14 = scalar_lea.vmem %s2621_s1, %s1758_s27 }
  0x18   : > { %v2148_v6 = vld [vmem:[%s2145_s21] sm:$0xff]  ;;  %v2153_v7 = vld [vmem:[%s2145_s21 + $0x8] sm:$0xff]  ;;  %v2156_v8 = vld [vmem:[%s2145_s21 + $0x10] sm:$0xff]  ;;  %p1964_p12 = scmp.ne.s32.totalorder %s2573_s16, %s1963_s23  ;;  %s1967_s26 = sshll.u32 %s2028_s24, 4  ;;  %s1968_s26 = int_to_ptr.vmem [resolvable:$false] %s1967_s26 }
  0x19   : > { %1846 = vmatprep.mubr.msk.f32.mxu0 %vm383_vm0, %v2148_v6  ;;  %v2163_v9 = vld [vmem:[%s2145_s21 + $0x18] sm:$0xff]  ;;  %v2166_v10 = vld [vmem:[%s2145_s21 + $0x20] sm:$0xff]  ;;  %v2173_v11 = vld [vmem:[%s2145_s21 + $0x28] sm:$0xff]  ;;  %s1969_s27 = scalar_lea.vmem %s1968_s26, 4096  ;;  %p1970_p1 = scmp.lt.s32.totalorder %s2573_s16, %s1968_s26 }
  0x1a   : > { %1847 = vmatmul.mubr.msk.f32.vlgmr.msra.gmra.mrb[0].mxu0 %vm383_vm0, %v2153_v7  ;;  %v2176_v12 = vld [vmem:[%s2145_s21 + $0x30] sm:$0xff]  ;;  %v2183_v13 = vld [vmem:[%s2145_s21 + $0x38] sm:$0xff]  ;;  %v2186_v14 = vld [vmem:[%s2145_s21 + $0x40] sm:$0xff]  ;;  %p1965_p13 = pnand %p1964_p12, %p2119_p5  ;;  %p1971_p2 = scmp.lt.s32.totalorder %s1969_s27, %s1963_s23 }
  0x1b   : > { %1849 = vmatprep.mubr.msk.f32.mxu0 %vm383_vm0, %v2156_v8  ;;  %v2193_v15 = vld [vmem:[%s2145_s21 + $0x48] sm:$0xff]  ;;  %v2196_v16 = vld [vmem:[%s2145_s21 + $0x50] sm:$0xff]  ;;  %v2203_v17 = vld [vmem:[%s2145_s21 + $0x58] sm:$0xff] }
  0x1c   : > { %v2206_v18 = vld [vmem:[%s2145_s21 + $0x60] sm:$0xff]  ;;  %v2213_v19 = vld [vmem:[%s2145_s21 + $0x68] sm:$0xff]  ;;  %v2216_v20 = vld [vmem:[%s2145_s21 + $0x70] sm:$0xff]  ;;  %p1966_p0 = pneg %p1965_p13  ;;  %p1972_p3 = por %p1971_p2, %p1970_p1 }
  0x1d   : > { %v2223_v21 = vld [vmem:[%s2145_s21 + $0x78] sm:$0xff] }
  0x1e   : > { %1850 = vmatmul.mubr.msk.f32.gmra.mrb[2].mxu0 %vm383_vm0, %v2163_v9  ;;  %p1973_p4 = pnand %p1972_p3, %p1966_p0 }
  0x1f   : > { %1852 = vmatprep.mubr.msk.f32.mxu0 %vm383_vm0, %v2166_v10 }
  0x22   : > { %1853 = vmatmul.mubr.msk.f32.gmra.mrb[4].mxu0 %vm383_vm0, %v2173_v11 }
  0x23   : > { %1855 = vmatprep.mubr.msk.f32.mxu0 %vm383_vm0, %v2176_v12 }
  0x26   : > { %1856 = vmatmul.mubr.msk.f32.gmra.mrb[6].mxu0 %vm383_vm0, %v2183_v13 }
  0x27   : > { %1858 = vmatprep.mubr.msk.f32.mxu0 %vm383_vm0, %v2186_v14 }
  0x2a   : > { %1859 = vmatmul.mubr.msk.f32.gmra.mrb[8].mxu0 %vm383_vm0, %v2193_v15 }
  0x2b   : > { %1861 = vmatprep.mubr.msk.f32.mxu0 %vm383_vm0, %v2196_v16 }
  0x2e   : > { %1862 = vmatmul.mubr.msk.f32.gmra.mrb[10].mxu0 %vm383_vm0, %v2203_v17 }
  0x2f   : > { %1864 = vmatprep.mubr.msk.f32.mxu0 %vm383_vm0, %v2206_v18 }
  0x32   : > { %1865 = vmatmul.mubr.msk.f32.gmra.mrb[12].mxu0 %vm383_vm0, %v2213_v19 }
  0x33   : > { %1867 = vmatprep.mubr.msk.f32.mxu0 %vm383_vm0, %v2216_v20 }
  0x36   : > { %1868 = vmatmul.mubr.msk.f32.gmra.mrb[14].mxu0 %vm383_vm0, %v2223_v21 }
  0xed   : > { %v1848_v23 = vpop.f32.mrb[0].mxu0 }
  0xee   : > { %v504_v24 = vadd.f32 %v1848_v23, %v2230_v22  ;;  %v498_v25 = vpop.f32.mrb[1].mxu0 }
  0xef   : > { %v499_v26 = vadd.f32 %v2230_v22, %v498_v25 }
  0xf0   : > { %v578_v28 = vmax.f32 %v504_v24, 0.0 }
  0xf1   : > { %v577_v29 = vmax.f32 %v499_v26, 0.0  ;;  %v1851_v30 = vpop.f32.mrb[2].mxu0 }
  0xf2   : > { %v514_v31 = vadd.f32 %v1851_v30, %v2230_v22  ;;  %v508_v32 = vpop.f32.mrb[3].mxu0  ;;  %v601_v33 = vmul.f32 %v2237_v27, %v578_v28 }
  0xf3   : > { %v509_v34 = vadd.f32 %v2230_v22, %v508_v32  ;;  %v600_v35 = vmul.f32 %v2237_v27, %v577_v29 }
  0xf4   : > { %v580_v36 = vmax.f32 %v514_v31, 0.0  ;;  %v619_v37 = vsel %vm383_vm0, %v601_v33, 0.0 }
  0xf5   : > { %v579_v38 = vmax.f32 %v509_v34, 0.0  ;;  %620 = vadd.xlane.f32.xlu0 %v619_v37  ;;  %v1854_v39 = vpop.f32.mrb[4].mxu0  ;;  %v616_v43 = vsel %vm383_vm0, %v600_v35, 0.0 }
  0xf6   : > { %v524_v40 = vadd.f32 %v1854_v39, %v2230_v22  ;;  %v518_v41 = vpop.f32.mrb[5].mxu0  ;;  %v603_v42 = vmul.f32 %v2237_v27, %v580_v36 }
  0xf7   : > { %v519_v45 = vadd.f32 %v2230_v22, %v518_v41  ;;  %v602_v47 = vmul.f32 %v2237_v27, %v579_v38 }
  0xf8   : > { %v582_v44 = vmax.f32 %v524_v40, 0.0  ;;  %v625_v46 = vsel %vm383_vm0, %v603_v42, 0.0 }
  0xf9   : > { %626 = vadd.xlane.f32.xlu1 %v625_v46  ;;  %617 = vadd.xlane.f32.xlu0 %v616_v43  ;;  %v1857_v48 = vpop.f32.mrb[6].mxu0  ;;  %v581_v51 = vmax.f32 %v519_v45, 0.0  ;;  %v622_v52 = vsel %vm383_vm0, %v602_v47, 0.0 }
  0xfa   : > { %v528_v49 = vpop.f32.mrb[7].mxu0  ;;  %v605_v53 = vmul.f32 %v2237_v27, %v582_v44  ;;  %v534_v2 = vadd.f32 %v1857_v48, %v2230_v22 }
  0xfb   : > { %v529_v50 = vadd.f32 %v2230_v22, %v528_v49  ;;  %v604_v61 = vmul.f32 %v2237_v27, %v581_v51 }
  0xfc   : > { %v631_v60 = vsel %vm383_vm0, %v605_v53, 0.0  ;;  %v584_v32 = vmax.f32 %v534_v2, 0.0 }
  0xfd   : > { %v1860_v54 = vpop.f32.mrb[8].mxu0  ;;  %623 = vadd.xlane.f32.xlu1 %v622_v52  ;;  %v583_v57 = vmax.f32 %v529_v50, 0.0  ;;  %v628_v24 = vsel %vm383_vm0, %v604_v61, 0.0 }
  0xfe   : > { %v544_v55 = vadd.f32 %v1860_v54, %v2230_v22  ;;  %v538_v56 = vpop.f32.mrb[9].mxu0  ;;  %v607_v44 = vmul.f32 %v2237_v27, %v584_v32 }
  0xff   : > { %v539_v58 = vadd.f32 %v2230_v22, %v538_v56  ;;  %v606_v5 = vmul.f32 %v2237_v27, %v583_v57 }
 0x100   : > { %v586_v59 = vmax.f32 %v544_v55, 0.0  ;;  %v637_v52 = vsel %vm383_vm0, %v607_v44, 0.0 }
 0x101   : > { %v1863_v62 = vpop.f32.mrb[10].mxu0  ;;  %632 = vadd.xlane.f32.xlu1 %v631_v60  ;;  %v585_v3 = vmax.f32 %v539_v58, 0.0  ;;  %v634_v33 = vsel %vm383_vm0, %v606_v5, 0.0 }
 0x102   : > { %v554_v63 = vadd.f32 %v1863_v62, %v2230_v22  ;;  %v548_v0 = vpop.f32.mrb[11].mxu0  ;;  %v609_v1 = vmul.f32 %v2237_v27, %v586_v59  ;;  %v700_v59 = vlaneseq }
 0x103   : > { %v549_v4 = vadd.f32 %v2230_v22, %v548_v0  ;;  %v608_v34 = vmul.f32 %v2237_v27, %v585_v3 }
 0x104   : > { %v588_v23 = vmax.f32 %v554_v63, 0.0  ;;  %v643_v25 = vsel %vm383_vm0, %v609_v1, 0.0  ;;  %v701_v61 = vand.u32 127, %v700_v59  ;;  %v2285_v62 = vshrl.u32 %v700_v59, 7  ;;  %v664_v59 = vld [vmem:[%s2317_s14] sm:$0xff] }
 0x105   : > { %v587_v26 = vmax.f32 %v549_v4, 0.0  ;;  %629 = vadd.xlane.f32.xlu1 %v628_v24  ;;  %644 = vadd.xlane.f32.xlu0 %v643_v25  ;;  %v1866_v28 = vpop.f32.mrb[12].mxu0  ;;  %v640_v46 = vsel %vm383_vm0, %v608_v34, 0.0  ;;  %vm666_vm7 = vcmp.ne.f32.partialorder %v664_v59, 0.0 }
 0x106   : > { %v564_v29 = vadd.f32 %v1866_v28, %v2230_v22  ;;  %v611_v30 = vmul.f32 %v2237_v27, %v588_v23  ;;  %v558_v31 = vpop.f32.mrb[13].mxu0 }
 0x107   : > { %v559_v37 = vadd.f32 %v2230_v22, %v558_v31  ;;  %v610_v38 = vmul.f32 %v2237_v27, %v587_v26 }
 0x108   : > { %v590_v35 = vmax.f32 %v564_v29, 0.0  ;;  %v649_v36 = vsel %vm383_vm0, %v611_v30, 0.0 }
 0x109   : > { %635 = vadd.xlane.f32.xlu1 %v634_v33  ;;  %650 = vadd.xlane.f32.xlu0 %v649_v36  ;;  %v1869_v39 = vpop.f32.mrb[14].mxu0  ;;  %v589_v45 = vmax.f32 %v559_v37, 0.0  ;;  %v646_v47 = vsel %vm383_vm0, %v610_v38, 0.0 }
 0x10a   : > { %v574_v40 = vadd.f32 %v1869_v39, %v2230_v22  ;;  %v568_v41 = vpop.f32.mrb[15].mxu0  ;;  %v613_v42 = vmul.f32 %v2237_v27, %v590_v35 }
 0x10b   : > { %v569_v43 = vadd.f32 %v2230_v22, %v568_v41  ;;  %v612_v53 = vmul.f32 %v2237_v27, %v589_v45 }
 0x10c   : > { %v592_v48 = vmax.f32 %v574_v40, 0.0  ;;  %v655_v50 = vsel %vm383_vm0, %v613_v42, 0.0 }
 0x10d   : > { %641 = vadd.xlane.f32.xlu1 %v640_v46  ;;  %647 = vadd.xlane.f32.xlu0 %v646_v47  ;;  %v591_v49 = vmax.f32 %v569_v43, 0.0  ;;  %v652_v55 = vsel %vm383_vm0, %v612_v53, 0.0 }
 0x10e   : > { %v615_v51 = vmul.f32 %v2237_v27, %v592_v48 }
 0x10f   : > { %v614_v22 = vmul.f32 %v2237_v27, %v591_v49  ;;  %v2291_v27 = vsub.s32 %v701_v61, %v2285_v62 }
 0x110   : > { %v661_v54 = vsel %vm383_vm0, %v615_v51, 0.0 }
 0x111   : > { %638 = vadd.xlane.f32.xlu1 %v637_v52  ;;  %656 = vadd.xlane.f32.xlu0 %v655_v50  ;;  %v658_v56 = vsel %vm383_vm0, %v614_v22, 0.0 }
 0x115   : > { %653 = vadd.xlane.f32.xlu0 %v652_v55  ;;  %662 = vadd.xlane.f32.xlu1 %v661_v54 }
 0x119   : > { %659 = vadd.xlane.f32.xlu0 %v658_v56 }
 0x182   : > { %v621_v58 = vpop.xlane.xlu0 %620 }
 0x183   : > { %v1778_v3 = vadd.f32 -1e+08, %v621_v58  ;;  %v709_v25 = vrot.slane %v621_v58, %v2291_v27 }
 0x185   : > { %v812_v30 = vrot.slane %v1778_v3, %v2291_v27 }
 0x186   : > { %v627_v57 = vpop.xlane.xlu1 %626  ;;  %v618_v63 = vpop.xlane.xlu0 %617 }
 0x187   : > { %v1777_v1 = vadd.f32 -1e+08, %v618_v63  ;;  %v705_v4 = vrot.slane %v618_v63, %v2291_v27  ;;  %v1780_v31 = vadd.f32 -1e+08, %v627_v57  ;;  %v717_v36 = vrot.slane %v627_v57, %v2291_v27 }
 0x189   : > { %v808_v26 = vrot.slane %v1777_v1, %v2291_v27  ;;  %v767_v32 = vsel %vm766_vm1, %v709_v25, %v705_v4  ;;  %v820_v42 = vrot.slane %v1780_v31, %v2291_v27 }
 0x18a   : > { %v624_v60 = vpop.xlane.xlu1 %623 }
 0x18b   : > { %v1779_v2 = vadd.f32 -1e+08, %v624_v60  ;;  %v713_v24 = vrot.slane %v624_v60, %v2291_v27  ;;  %v869_v37 = vsel %vm766_vm1, %v812_v30, %v808_v26 }
 0x18d   : > { %v816_v28 = vrot.slane %v1779_v2, %v2291_v27  ;;  %v769_v35 = vsel %vm768_vm2, %v713_v24, %v767_v32 }
 0x18e   : > { %v2288_v0 = vpop.xlane.xlu1 %632  ;;  %v771_v44 = vsel %vm770_vm3, %v717_v36, %v769_v35 }
 0x18f   : > { %v870_v40 = vsel %vm768_vm2, %v816_v28, %v869_v37  ;;  %v1782_v43 = vadd.f32 -1e+08, %v2288_v0  ;;  %v725_v48 = vrot.slane %v2288_v0, %v2291_v27 }
 0x190   : > { %v871_v53 = vsel %vm770_vm3, %v820_v42, %v870_v40 }
 0x191   : > { %v828_v3 = vrot.slane %v1782_v43, %v2291_v27 }
 0x192   : > { %v630_v5 = vpop.xlane.xlu1 %629  ;;  %v645_v23 = vpop.xlane.xlu0 %644 }
 0x193   : > { %v1781_v29 = vadd.f32 -1e+08, %v630_v5  ;;  %v721_v38 = vrot.slane %v630_v5, %v2291_v27  ;;  %v1786_v39 = vadd.f32 -1e+08, %v645_v23  ;;  %v741_v22 = vrot.slane %v645_v23, %v2291_v27 }
 0x195   : > { %v824_v41 = vrot.slane %v1781_v29, %v2291_v27  ;;  %v773_v52 = vsel %vm772_vm4, %v721_v38, %v771_v44  ;;  %v844_v54 = vrot.slane %v1786_v39, %v2291_v27 }
 0x196   : > { %v636_v33 = vpop.xlane.xlu1 %635  ;;  %v2302_v34 = vpop.xlane.xlu0 %650  ;;  %v775_v24 = vsel %vm774_vm5, %v725_v48, %v773_v52 }
 0x197   : > { %v1783_v45 = vadd.f32 -1e+08, %v636_v33  ;;  %v872_v55 = vsel %vm772_vm4, %v824_v41, %v871_v53  ;;  %v729_v56 = vrot.slane %v636_v33, %v2291_v27  ;;  %v1788_v61 = vadd.f32 -1e+08, %v2302_v34  ;;  %v665_v53 = vld [vmem:[%s2317_s14 + $0x8] sm:$0xff]  ;;  %s1811_s14 = sshll.u32 %s2102_s13, 11 }
 0x198   : > { %v749_v25 = vrot.slane %v2302_v34, %v2291_v27  ;;  %v873_v29 = vsel %vm774_vm5, %v828_v3, %v872_v55  ;;  %vm667_vm10 = vcmp.ne.f32.partialorder %v665_v53, 0.0  ;;  %s2571_s22 = scalar_lea.hbm %s2629_s9, %s1811_s14  ;;  %s2579_s13 = scalar_lea.sflag [#allocation3], %s340_s25 }
 0x199   : > { %v832_v60 = vrot.slane %v1783_v45, %v2291_v27  ;;  %v852_v30 = vrot.slane %v1788_v61, %v2291_v27  ;;  %v777_v33 = vsel %vm776_vm6, %v729_v56, %v775_v24 }
 0x19a   : > { %v642_v46 = vpop.xlane.xlu1 %641  ;;  %v648_v47 = vpop.xlane.xlu0 %647 }
 0x19b   : > { %v1785_v49 = vadd.f32 -1e+08, %v642_v46  ;;  %v737_v50 = vrot.slane %v642_v46, %v2291_v27  ;;  %v1787_v51 = vadd.f32 -1e+08, %v648_v47  ;;  %v745_v58 = vrot.slane %v648_v47, %v2291_v27 }
 0x19c   : > { %v874_v35 = vsel %vm776_vm6, %v832_v60, %v873_v29 }
 0x19d   : > { %v840_v57 = vrot.slane %v1785_v49, %v2291_v27  ;;  %v780_v63 = vsel %vm766_vm1, %v741_v22, %v737_v50  ;;  %v848_v0 = vrot.slane %v1787_v51, %v2291_v27 }
 0x19e   : > { %v639_v1 = vpop.xlane.xlu1 %638  ;;  %v657_v2 = vpop.xlane.xlu0 %656  ;;  %v781_v26 = vsel %vm768_vm2, %v745_v58, %v780_v63 }
 0x19f   : > { %v876_v4 = vsel %vm766_vm1, %v844_v54, %v840_v57  ;;  %v1784_v5 = vadd.f32 -1e+08, %v639_v1  ;;  %v733_v23 = vrot.slane %v639_v1, %v2291_v27  ;;  %v1790_v40 = vadd.f32 -1e+08, %v657_v2 }
 0x1a0   : > { %v877_v31 = vsel %vm768_vm2, %v848_v0, %v876_v4  ;;  %v782_v41 = vsel %vm770_vm3, %v749_v25, %v781_v26  ;;  %v757_v47 = vrot.slane %v657_v2, %v2291_v27 }
 0x1a1   : > { %v836_v28 = vrot.slane %v1784_v5, %v2291_v27  ;;  %v779_v34 = vsel %vm778_vm8, %v733_v23, %v777_v33  ;;  %v878_v48 = vsel %vm770_vm3, %v852_v30, %v877_v31  ;;  %v860_v22 = vrot.slane %v1790_v40, %v2291_v27 }
 0x1a2   : > { %v654_v32 = vpop.xlane.xlu0 %653  ;;  %v663_v36 = vpop.xlane.xlu1 %662  ;;  %v2375_v31 = vsub.s32 1, %v2285_v62 }
 0x1a3   : > { %v1789_v37 = vadd.f32 -1e+08, %v654_v32  ;;  %v753_v38 = vrot.slane %v654_v32, %v2291_v27  ;;  %v875_v39 = vsel %vm778_vm8, %v836_v28, %v874_v35  ;;  %v1792_v43 = vadd.f32 -1e+08, %v663_v36 }
 0x1a4   : > { %v885_v42 = vsel %vm666_vm7, %v779_v34, %v875_v39  ;;  %v765_v54 = vrot.slane %v663_v36, %v2291_v27  ;;  %v2378_v32 = vsub.s32 0, %v2285_v62  ;;  %v2387_v39 = vsub.s32 3, %v2285_v62 }
 0x1a5   : > { %v783_v44 = vsel %vm772_vm4, %v753_v38, %v782_v41  ;;  %v856_v45 = vrot.slane %v1789_v37, %v2291_v27  ;;  %v888_v46 = vsel %vm887_vm9, %v885_v42, -inf  ;;  %v868_v55 = vrot.slane %v1792_v43, %v2291_v27 }
 0x1a6   : > { %889 = vmax.xlane.f32.xlu0 %v888_v46  ;;  %v660_v49 = vpop.xlane.xlu0 %659  ;;  %v784_v56 = vsel %vm774_vm5, %v757_v47, %v783_v44  ;;  %v2383_v38 = vsub.s32 2, %v2285_v62  ;;  %v2391_v43 = vsub.s32 4, %v2285_v62  ;;  %v2396_v46 = vsub.s32 5, %v2285_v62 }
 0x1a7   : > { %v879_v50 = vsel %vm772_vm4, %v856_v45, %v878_v48  ;;  %v1791_v51 = vadd.f32 -1e+08, %v660_v49  ;;  %v761_v52 = vrot.slane %v660_v49, %v2291_v27  ;;  %v2401_v49 = vsub.s32 6, %v2285_v62 }
 0x1a8   : > { %v880_v59 = vsel %vm774_vm5, %v860_v22, %v879_v50  ;;  %v2408_v22 = vsub.s32 7, %v2285_v62 }
 0x1a9   : > { %v864_v57 = vrot.slane %v1791_v51, %v2291_v27  ;;  %v785_v58 = vsel %vm776_vm6, %v761_v52, %v784_v56  ;;  %v1150_v56 = vld [vmem:[%s2625_s5] sm:$0xff] }
 0x1aa   : > { %v786_v61 = vsel %vm778_vm8, %v765_v54, %v785_v58 }
 0x1ab   : > { %v881_v60 = vsel %vm776_vm6, %v864_v57, %v880_v59  ;;  %v1151_v57 = vld [vmem:[%s2625_s5 + $0x8] sm:$0xff] }
 0x1ac   : > { %v882_v63 = vsel %vm778_vm8, %v868_v55, %v881_v60  ;;  %v1889_v59 = vpack.c.bf16 %v1151_v57, %v1150_v56  ;;  %v1152_v60 = vld [vmem:[%s2625_s5 + $0x10] sm:$0xff] }
 0x1ad   : > { %v886_v0 = vsel %vm667_vm10, %v786_v61, %v882_v63  ;;  %v1153_v61 = vld [vmem:[%s2625_s5 + $0x18] sm:$0xff] }
 0x1ae   : > { %v891_v1 = vsel %vm887_vm9, %v886_v0, -inf  ;;  %1890 = vmatprep.subr.bf16.mxu1 %v1889_v59  ;;  %v1893_v63 = vpack.c.bf16 %v1153_v61, %v1152_v60 }
 0x1af   : > { %892 = vmax.xlane.f32.xlu1 %v891_v1  ;;  %1892 = vmatpush3.bf16.msra.mxu1 %v1889_v59 }
 0x1b0   : > { %1894 = vmatprep.subr.bf16.mxu1 %v1893_v63 }
 0x1b3   : > { %1896 = vmatpush3.bf16.msra.mxu1 %v1893_v63 }
 0x233   : > { %v890_v2 = vpop.xlane.xlu0 %889 }
 0x234   : > { %v894_v3 = vsub.f32 %v885_v42, %v890_v2 }
 0x236   : > { %v896_v4 = vmul.f32 1.442695, %v894_v3 }
 0x238   : > { %1955 = vpow2.f32 %v896_v4 }
 0x23c   : > { %v893_v27 = vpop.xlane.xlu1 %892 }
 0x23d   : > { %v895_v5 = vsub.f32 %v886_v0, %v893_v27 }
 0x23f   : > { %v898_v23 = vmul.f32 1.442695, %v895_v5 }
 0x241   : > { %1957 = vpow2.f32 %v898_v23 }
 0x242   : > { %v1956_v24 = vpop.eup %1955 }
 0x243   : > { %v900_v25 = vsel %vm887_vm9, %v1956_v24, 0.0 }
 0x244   : > { %901 = vadd.xlane.f32.xlu0 %v900_v25 }
 0x24b   : > { %v1958_v26 = vpop.eup %1957 }
 0x24c   : > { %v903_v28 = vsel %vm887_vm9, %v1958_v26, 0.0 }
 0x24d   : > { %904 = vadd.xlane.f32.xlu1 %v903_v28 }
 0x2d1   : > { %v902_v29 = vpop.xlane.xlu0 %901 }
 0x2d2   : > { %1959 = vrcp.f32 %v902_v29 }
 0x2da   : > { %v905_v30 = vpop.xlane.xlu1 %904 }
 0x2db   : > { %1961 = vrcp.f32 %v905_v30 }
 0x2dc   : > { %v1960_v33 = vpop.eup %1959 }
 0x2dd   : > { %v907_v35 = vmul.f32 %v1960_v33, %v1956_v24 }
 0x2df   : > { %v920_v36 = vrot.slane %v907_v35, %v2375_v31  ;;  %v913_v37 = vrot.slane %v907_v35, %v2378_v32  ;;  %v927_v34 = vrot.slane %v907_v35, %v2383_v38  ;;  %v934_v42 = vrot.slane %v907_v35, %v2387_v39 }
 0x2e0   : > { %v941_v45 = vrot.slane %v907_v35, %v2391_v43  ;;  %v948_v48 = vrot.slane %v907_v35, %v2396_v46  ;;  %v955_v51 = vrot.slane %v907_v35, %v2401_v49  ;;  %v962_v55 = vrot.slane %v907_v35, %v2408_v22 }
 0x2e1   : > { %922 = vbcast.lane.b32.xlu1 %v920_v36, 256  ;;  %915 = vbcast.lane.b32.xlu0 %v913_v37, 256 }
 0x2e5   : > { %v1962_v40 = vpop.eup %1961  ;;  %929 = vbcast.lane.b32.xlu1 %v927_v34, 256 }
 0x2e6   : > { %v909_v41 = vmul.f32 %v1962_v40, %v1958_v26 }
 0x2e8   : > { %v976_v44 = vrot.slane %v909_v41, %v2375_v31  ;;  %v983_v47 = vrot.slane %v909_v41, %v2383_v38  ;;  %v990_v50 = vrot.slane %v909_v41, %v2387_v39  ;;  %v997_v52 = vrot.slane %v909_v41, %v2391_v43 }
 0x2e9   : > { %936 = vbcast.lane.b32.xlu1 %v934_v42, 256  ;;  %v969_v53 = vrot.slane %v909_v41, %v2378_v32  ;;  %v1004_v54 = vrot.slane %v909_v41, %v2396_v46  ;;  %v1011_v58 = vrot.slane %v909_v41, %v2401_v49  ;;  %v1018_v62 = vrot.slane %v909_v41, %v2408_v22 }
 0x2ea   : > { %978 = vbcast.lane.b32.xlu0 %v976_v44, 256 }
 0x2ed   : > { %943 = vbcast.lane.b32.xlu1 %v941_v45, 256 }
 0x2ee   : > { %985 = vbcast.lane.b32.xlu0 %v983_v47, 256 }
 0x2f1   : > { %950 = vbcast.lane.b32.xlu1 %v948_v48, 256 }
 0x2f2   : > { %992 = vbcast.lane.b32.xlu0 %v990_v50, 256 }
 0x2f5   : > { %957 = vbcast.lane.b32.xlu1 %v955_v51, 256 }
 0x2f6   : > { %999 = vbcast.lane.b32.xlu0 %v997_v52, 256 }
 0x2f9   : > { %971 = vbcast.lane.b32.xlu1 %v969_v53, 256 }
 0x2fa   : > { %1006 = vbcast.lane.b32.xlu0 %v1004_v54, 256 }
 0x2fd   : > { %964 = vbcast.lane.b32.xlu1 %v962_v55, 256 }
 0x2fe   : > { %1013 = vbcast.lane.b32.xlu0 %v1011_v58, 256 }
 0x301   : > { %1020 = vbcast.lane.b32.xlu1 %v1018_v62, 256 }
 0x353   : > { %v923_v0 = vpop.permute.xlu1 %922  ;;  %v916_v1 = vpop.permute.xlu0 %915 }
 0x354   : > { %v1023_v2 = vmul.f32 %v923_v0, %v2153_v7  ;;  %v1022_v3 = vmul.f32 %v916_v1, %v2148_v6 }
 0x356   : > { %v1045_v4 = vsel %vm383_vm0, %v1023_v2, 0.0  ;;  %v1038_v27 = vsel %vm383_vm0, %v1022_v3, 0.0 }
 0x357   : > { %v1046_v5 = vrot.slane %v1045_v4, 4  ;;  %v1039_v23 = vrot.slane %v1038_v27, 4  ;;  %v930_v24 = vpop.permute.xlu1 %929 }
 0x358   : > { %v1024_v25 = vmul.f32 %v930_v24, %v2156_v8 }
 0x359   : > { %v1047_v26 = vadd.f32 %v1046_v5, %v1045_v4  ;;  %v1040_v28 = vadd.f32 %v1039_v23, %v1038_v27 }
 0x35a   : > { %v1052_v29 = vsel %vm383_vm0, %v1024_v25, 0.0 }
 0x35b   : > { %v1048_v30 = vrot.slane %v1047_v26, 2  ;;  %v1041_v33 = vrot.slane %v1040_v28, 2  ;;  %v1053_v35 = vrot.slane %v1052_v29, 4  ;;  %v937_v36 = vpop.permute.xlu1 %936 }
 0x35c   : > { %v1025_v7 = vmul.f32 %v937_v36, %v2163_v9  ;;  %v979_v6 = vpop.permute.xlu0 %978 }
 0x35d   : > { %v1054_v37 = vadd.f32 %v1053_v35, %v1052_v29  ;;  %v1031_v34 = vmul.f32 %v979_v6, %v2193_v15  ;;  %v1049_v40 = vadd.f32 %v1048_v30, %v1047_v26  ;;  %v1042_v42 = vadd.f32 %v1041_v33, %v1040_v28 }
 0x35e   : > { %v1059_v41 = vsel %vm383_vm0, %v1025_v7, 0.0 }
 0x35f   : > { %v1055_v44 = vrot.slane %v1054_v37, 2  ;;  %v1060_v8 = vrot.slane %v1059_v41, 4  ;;  %v944_v45 = vpop.permute.xlu1 %943  ;;  %v1101_v47 = vsel %vm383_vm0, %v1031_v34, 0.0  ;;  %v1050_v53 = vrot.slane %v1049_v40, 1 }
 0x360   : > { %v1026_v48 = vmul.f32 %v944_v45, %v2166_v10  ;;  %v986_v50 = vpop.permute.xlu0 %985  ;;  %v1102_v9 = vrot.slane %v1101_v47, 4  ;;  %v1043_v55 = vrot.slane %v1042_v42, 1 }
 0x361   : > { %v1056_v51 = vadd.f32 %v1055_v44, %v1054_v37  ;;  %v1061_v52 = vadd.f32 %v1060_v8, %v1059_v41  ;;  %v1032_v15 = vmul.f32 %v986_v50, %v2196_v16  ;;  %v1051_v2 = vadd.f32 %v1050_v53, %v1049_v40 }
 0x362   : > { %v1066_v54 = vsel %vm383_vm0, %v1026_v48, 0.0  ;;  %v1103_v59 = vadd.f32 %v1102_v9, %v1101_v47  ;;  %v1044_v16 = vadd.f32 %v1043_v55, %v1042_v42 }
 0x363   : > { %v1062_v56 = vrot.slane %v1061_v52, 2  ;;  %v1067_v57 = vrot.slane %v1066_v54, 4  ;;  %v951_v58 = vpop.permute.xlu1 %950  ;;  %v1108_v62 = vsel %vm383_vm0, %v1032_v15, 0.0  ;;  %v1057_v10 = vrot.slane %v1056_v51, 1 }
 0x364   : > { %v1027_v60 = vmul.f32 %v951_v58, %v2173_v11  ;;  %v993_v61 = vpop.permute.xlu0 %992  ;;  %v1109_v1 = vrot.slane %v1108_v62, 4  ;;  %v1104_v27 = vrot.slane %v1103_v59, 2 }
 0x365   : > { %v1063_v63 = vadd.f32 %v1062_v56, %v1061_v52  ;;  %v1068_v0 = vadd.f32 %v1067_v57, %v1066_v54  ;;  %v1033_v4 = vmul.f32 %v993_v61, %v2203_v17  ;;  %v1058_v28 = vadd.f32 %v1057_v10, %v1056_v51 }
 0x366   : > { %v1073_v3 = vsel %vm383_vm0, %v1027_v60, 0.0  ;;  %v1110_v5 = vadd.f32 %v1109_v1, %v1108_v62  ;;  %v1177_v17 = vsel %vm766_vm1, %v1051_v2, %v1044_v16  ;;  %v1105_v6 = vadd.f32 %v1104_v27, %v1103_v59 }
 0x367   : > { %v1074_v23 = vrot.slane %v1073_v3, 4  ;;  %v958_v24 = vpop.permute.xlu1 %957  ;;  %v1115_v25 = vsel %vm383_vm0, %v1033_v4, 0.0  ;;  %v1064_v29 = vrot.slane %v1063_v63, 1  ;;  %v1069_v30 = vrot.slane %v1068_v0, 2 }
 0x368   : > { %v1028_v26 = vmul.f32 %v958_v24, %v2176_v12  ;;  %v1000_v11 = vpop.permute.xlu0 %999  ;;  %v1116_v35 = vrot.slane %v1115_v25, 4  ;;  %v1111_v37 = vrot.slane %v1110_v5, 2  ;;  %v1178_v50 = vsel %vm768_vm2, %v1058_v28, %v1177_v17 }
 0x369   : > { %v1075_v33 = vadd.f32 %v1074_v23, %v1073_v3  ;;  %v1034_v7 = vmul.f32 %v1000_v11, %v2206_v18  ;;  %v2450_v45 = vadd.f32 %v1064_v29, %v1063_v63  ;;  %v1070_v47 = vadd.f32 %v1069_v30, %v1068_v0 }
 0x36a   : > { %v1080_v36 = vsel %vm383_vm0, %v1028_v26, 0.0  ;;  %v1117_v42 = vadd.f32 %v1116_v35, %v1115_v25  ;;  %v1106_v9 = vrot.slane %v1105_v6, 1  ;;  %v1112_v54 = vadd.f32 %v1111_v37, %v1110_v5 }
 0x36b   : > { %v1081_v34 = vrot.slane %v1080_v36, 4  ;;  %v972_v40 = vpop.permute.xlu1 %971  ;;  %v1076_v41 = vrot.slane %v1075_v33, 2  ;;  %v1122_v12 = vsel %vm383_vm0, %v1034_v7, 0.0  ;;  %v1071_v60 = vrot.slane %v1070_v47, 1 }
 0x36c   : > { %v1030_v44 = vmul.f32 %v972_v40, %v2186_v14  ;;  %v1007_v8 = vpop.permute.xlu0 %1006  ;;  %v1118_v18 = vrot.slane %v1117_v42, 2  ;;  %v1123_v51 = vrot.slane %v1122_v12, 4  ;;  %v1113_v3 = vrot.slane %v1112_v54, 1 }
 0x36d   : > { %v1082_v48 = vadd.f32 %v1081_v34, %v1080_v36  ;;  %v1035_v53 = vmul.f32 %v1007_v8, %v2213_v19  ;;  %v1077_v57 = vadd.f32 %v1076_v41, %v1075_v33  ;;  %v1107_v30 = vadd.f32 %v1106_v9, %v1105_v6 }
 0x36e   : > { %v1094_v52 = vsel %vm383_vm0, %v1030_v44, 0.0  ;;  %v1124_v14 = vadd.f32 %v1123_v51, %v1122_v12  ;;  %v1119_v61 = vadd.f32 %v1118_v18, %v1117_v42  ;;  %v1072_v34 = vadd.f32 %v1071_v60, %v1070_v47 }
 0x36f   : > { %v1083_v15 = vrot.slane %v1082_v48, 2  ;;  %v1095_v55 = vrot.slane %v1094_v52, 4  ;;  %v965_v56 = vpop.permute.xlu1 %964  ;;  %v1129_v58 = vsel %vm383_vm0, %v1035_v53, 0.0  ;;  %v1078_v23 = vrot.slane %v1077_v57, 1 }
 0x370   : > { %v1029_v59 = vmul.f32 %v965_v56, %v2183_v13  ;;  %v1014_v62 = vpop.permute.xlu0 %1013  ;;  %v1130_v63 = vrot.slane %v1129_v58, 4  ;;  %v1125_v1 = vrot.slane %v1124_v14, 2  ;;  %v1120_v33 = vrot.slane %v1119_v61, 1 }
 0x371   : > { %v1096_v10 = vadd.f32 %v1095_v55, %v1094_v52  ;;  %v1084_v0 = vadd.f32 %v1083_v15, %v1082_v48  ;;  %v1036_v2 = vmul.f32 %v1014_v62, %v2216_v20  ;;  %v1114_v40 = vadd.f32 %v1113_v3, %v1112_v54  ;;  %v1273_v3 = vld [vmem:[%s2627_s7 + $0x8] sm:$0xff] }
 0x372   : > { %v1087_v19 = vsel %vm383_vm0, %v1029_v59, 0.0  ;;  %v1131_v16 = vadd.f32 %v1130_v63, %v1129_v58  ;;  %v1126_v24 = vadd.f32 %v1125_v1, %v1124_v14  ;;  %v1079_v12 = vadd.f32 %v1078_v23, %v1077_v57 }
 0x373   : > { %v1097_v4 = vrot.slane %v1096_v10, 2  ;;  %v1088_v27 = vrot.slane %v1087_v19, 4  ;;  %v1021_v5 = vpop.permute.xlu1 %1020  ;;  %v1136_v13 = vsel %vm383_vm0, %v1036_v2, 0.0  ;;  %v1085_v35 = vrot.slane %v1084_v0, 1 }
 0x374   : > { %v1037_v25 = vmul.f32 %v1021_v5, %v2223_v21  ;;  %v1132_v11 = vrot.slane %v1131_v16, 2  ;;  %v1137_v29 = vrot.slane %v1136_v13, 4  ;;  %v1127_v41 = vrot.slane %v1126_v24, 1  ;;  %v1280_v5 = vld [vmem:[%s2627_s7 + $0x40] sm:$0xff] }
 0x375   : > { %v1098_v26 = vadd.f32 %v1097_v4, %v1096_v10  ;;  %v1089_v28 = vadd.f32 %v1088_v27, %v1087_v19  ;;  %v1121_v48 = vadd.f32 %v1120_v33, %v1119_v61  ;;  %v1086_v6 = vadd.f32 %v1085_v35, %v1084_v0  ;;  %v1281_v4 = vld [vmem:[%s2627_s7 + $0x48] sm:$0xff] }
 0x376   : > { %v1143_v20 = vsel %vm383_vm0, %v1037_v25, 0.0  ;;  %v1133_v7 = vadd.f32 %v1132_v11, %v1131_v16  ;;  %v1138_v37 = vadd.f32 %v1137_v29, %v1136_v13  ;;  %v1179_v15 = vsel %vm770_vm3, %v2450_v45, %v1178_v50  ;;  %v1272_v16 = vld [vmem:[%s2627_s7] sm:$0xff]  ;;  %v1283_v13 = vld [vmem:[%s2627_s7 + $0x58] sm:$0xff]  ;;  %v1274_v29 = vld [vmem:[%s2627_s7 + $0x10] sm:$0xff] }
 0x377   : > { %v1099_v36 = vrot.slane %v1098_v26, 1  ;;  %v1090_v17 = vrot.slane %v1089_v28, 2  ;;  %v1144_v42 = vrot.slane %v1143_v20, 4  ;;  %v1128_v55 = vadd.f32 %v1127_v41, %v1126_v24  ;;  %v1275_v24 = vld [vmem:[%s2627_s7 + $0x18] sm:$0xff]  ;;  %v1793_v11 = vld [vmem:[%s2626_s6] ss:$0 sm:$0xff] }
 0x378   : > { %v1139_v8 = vrot.slane %v1138_v37, 2  ;;  %v1134_v18 = vrot.slane %v1133_v7, 1  ;;  %v1180_v56 = vsel %vm772_vm4, %v1072_v34, %v1179_v15  ;;  %v1897_v27 = vpack.c.bf16 %v1281_v4, %v1273_v3  ;;  %v1277_v35 = vld [vmem:[%s2627_s7 + $0x28] sm:$0xff]  ;;  %v1276_v41 = vld [vmem:[%s2627_s7 + $0x20] sm:$0xff] }
 0x379   : > { %v1100_v44 = vadd.f32 %v1099_v36, %v1098_v26  ;;  %v1091_v21 = vadd.f32 %v1090_v17, %v1089_v28  ;;  %v1145_v51 = vadd.f32 %v1144_v42, %v1143_v20  ;;  %v1181_v58 = vsel %vm774_vm5, %v1079_v12, %v1180_v56  ;;  %v1285_v20 = vld [vmem:[%s2627_s7 + $0x68] sm:$0xff]  ;;  %v1284_v42 = vld [vmem:[%s2627_s7 + $0x60] sm:$0xff]  ;;  %v1279_v12 = vld [vmem:[%s2627_s7 + $0x38] sm:$0xff] }
 0x37a   : > { %v1140_v53 = vadd.f32 %v1139_v8, %v1138_v37  ;;  %v1135_v62 = vadd.f32 %v1134_v18, %v1133_v7  ;;  %v1182_v61 = vsel %vm776_vm6, %v1086_v6, %v1181_v58  ;;  %v2027_v23 = vmov 0.0   ;;  %1898 = vmatprep.subr.bf16.mxu1 %v1897_v27  ;;  %v1286_v18 = vld [vmem:[%s2627_s7 + $0x70] sm:$0xff]  ;;  %v1288_v6 = vld [vmem:[%s2628_s8] sm:$0xff] }
 0x37b   : > { %v1184_v52 = vsel %vm766_vm1, %v1107_v30, %v1100_v44  ;;  %v1092_v9 = vrot.slane %v1091_v21, 1  ;;  %v1146_v54 = vrot.slane %v1145_v51, 2  ;;  %v1899_v25 = vpack.c.bf16 %v1280_v5, %v1272_v16  ;;  %v1282_v30 = vld [vmem:[%s2627_s7 + $0x50] sm:$0xff]  ;;  %v1287_v44 = vld [vmem:[%s2627_s7 + $0x78] sm:$0xff] }
 0x37c   : > { %v1185_v47 = vsel %vm768_vm2, %v1114_v40, %v1184_v52  ;;  %v1141_v57 = vrot.slane %v1140_v53, 1  ;;  %v1901_v26 = vpack.c.bf16 %v1283_v13, %v1275_v24  ;;  %v1903_v7 = vpack.c.bf16 %v1282_v30, %v1274_v29 }
 0x37d   : > { %v1093_v14 = vadd.f32 %v1092_v9, %v1091_v21  ;;  %v1186_v59 = vsel %vm770_vm3, %v1121_v48, %v1185_v47  ;;  %v1147_v60 = vadd.f32 %v1146_v54, %v1145_v51  ;;  %v1905_v34 = vpack.c.bf16 %v1285_v20, %v1277_v35  ;;  %v1278_v48 = vld [vmem:[%s2627_s7 + $0x30] sm:$0xff] }
 0x37e   : > { %v1187_v10 = vsel %vm772_vm4, %v1128_v55, %v1186_v59  ;;  %v1142_v63 = vadd.f32 %v1141_v57, %v1140_v53  ;;  %v1907_v21 = vpack.c.bf16 %v1284_v42, %v1276_v41  ;;  %v1909_v8 = vpack.c.bf16 %v1287_v44, %v1279_v12 }
 0x37f   : > { %v1183_v45 = vsel %vm778_vm8, %v1093_v14, %v1182_v61  ;;  %v1148_v50 = vrot.slane %v1147_v60, 1  ;;  %v1188_v0 = vsel %vm774_vm5, %v1135_v62, %v1187_v10  ;;  %v1911_v51 = vpack.c.bf16 %v1286_v18, %v1278_v48 }
 0x380   : > { %1878 = vmatprep.mubr.msk.f32.mxu1 %vm383_vm0, %v1183_v45  ;;  %v1189_v19 = vsel %vm776_vm6, %v1142_v63, %v1188_v0  ;;  %v1293_v52 = vrot.slane %v1288_v6, %v2378_v32  ;;  %v1297_v53 = vrot.slane %v1288_v6, %v2375_v31  ;;  %v1301_v32 = vrot.slane %v1288_v6, %v2383_v38 }
 0x381   : > { %v1149_v1 = vadd.f32 %v1148_v50, %v1147_v60  ;;  %v1305_v14 = vrot.slane %v1288_v6, %v2387_v39  ;;  %v1309_v38 = vrot.slane %v1288_v6, %v2391_v43  ;;  %v1313_v39 = vrot.slane %v1288_v6, %v2396_v46 }
 0x382   : > { %v1317_v4 = vrot.slane %v1288_v6, %v2401_v49  ;;  %v1321_v46 = vrot.slane %v1288_v6, %v2408_v22 }
 0x383   : > { %v1190_v2 = vsel %vm778_vm8, %v1149_v1, %v1189_v19 }
 0x384   : > { %1879 = vmatmul.mubr.msk.f32.vlgmr.msra.gmra.mrb[0].mxu1 %vm383_vm0, %v1190_v2 }
 0x385   : > { %1401 = vmatprep.mubr.f32.mxu1 %v2027_v23  ;;  %1900 = vmatpush1.bf16.msra.mxu1 %v1899_v25 }
 0x386   : > { %1902 = vmatprep.subr.bf16.mxu1 %v1901_v26 }
 0x457   : > { %v1880_v28 = vpop.f32.mrb[0].mxu1 }
 0x458   : > { %v1261_v33 = vpop.f32.mrb[1].mxu1  ;;  %v1267_v17 = vadd.f32 %v1880_v28, %v1793_v11 }
 0x459   : > { %v1262_v36 = vadd.f32 %v1793_v11, %v1261_v33 }
 0x45a   : > { %v1271_v40 = vmax.f32 %v1267_v17, 0.0 }
 0x45b   : > { %v1270_v37 = vmax.f32 %v1262_v36, 0.0 }
 0x45d   : > { %1796 = vmatmul.mubr.msk.f32.vlgmr.msra.gmra.mrb[2].mxu1 %vm1330_vm11, %v1270_v37 }
 0x45e   : > { %1904 = vmatpush1.bf16.msra.mxu1 %v1903_v7  ;;  %1407 = vmatprep.mubr.f32.mxu1 %v2027_v23 }
 0x45f   : > { %1906 = vmatprep.subr.bf16.mxu1 %v1905_v34 }
 0x461   : > { %1797 = vmatmul.mubr.msk.f32.gmra.mrb[4].mxu1 %vm1330_vm11, %v1271_v40 }
 0x462   : > { %1478 = vmatprep.mubr.f32.mxu1 %v2027_v23 }
 0x465   : > { %1798 = vmatmul.mubr.msk.f32.vlgmr.msra.gmra.mrb[6].mxu1 %vm1330_vm11, %v1270_v37 }
 0x466   : > { %1908 = vmatpush1.bf16.msra.mxu1 %v1907_v21  ;;  %1484 = vmatprep.mubr.f32.mxu1 %v2027_v23 }
 0x467   : > { %1910 = vmatprep.subr.bf16.mxu1 %v1909_v8 }
 0x469   : > { %1799 = vmatmul.mubr.msk.f32.gmra.mrb[8].mxu1 %vm1330_vm11, %v1271_v40 }
 0x46a   : > { %1555 = vmatprep.mubr.f32.mxu1 %v2027_v23 }
 0x46d   : > { %1800 = vmatmul.mubr.msk.f32.vlgmr.msra.gmra.mrb[10].mxu1 %vm1330_vm11, %v1270_v37 }
 0x46e   : > { %1912 = vmatpush1.bf16.msra.mxu1 %v1911_v51  ;;  %1561 = vmatprep.mubr.f32.mxu1 %v2027_v23 }
 0x471   : > { %1801 = vmatmul.mubr.msk.f32.gmra.mrb[12].mxu1 %vm1330_vm11, %v1271_v40 }
 0x472   : > { %1632 = vmatprep.mubr.f32.mxu1 %v2027_v23 }
 0x475   : > { %1802 = vmatmul.mubr.msk.f32.vlgmr.msra.gmra.mrb[14].mxu1 %vm1330_vm11, %v1270_v37 }
 0x476   : > { %1638 = vmatprep.mubr.f32.mxu1 %v2027_v23 }
 0x479   : > { %1803 = vmatmul.mubr.msk.f32.gmra.mrb[16].mxu1 %vm1330_vm11, %v1271_v40 }
 0x530   : > { %v1403_v9 = vpop.f32.mrb[2].mxu1 }
 0x531   : > { %v1404_v15 = vadd.f32 %v1403_v9, %v1293_v52  ;;  %v1405_v55 = vpop.f32.mrb[3].mxu1 }
 0x532   : > { %v1406_v47 = vadd.f32 %v1405_v55, %v1297_v53 }
 0x533   : > { %1645 = vst [vmem:[%s2544_s29] sm:$0xff] %v1404_v15 }
 0x534   : > { %1646 = vst [vmem:[%s2544_s29 + $0x8] sm:$0xff] %v1406_v47  ;;  %v1409_v54 = vpop.f32.mrb[4].mxu1 }
 0x535   : > { %v1410_v56 = vadd.f32 %v1409_v54, %v1293_v52  ;;  %v1411_v57 = vpop.f32.mrb[5].mxu1 }
 0x536   : > { %v1412_v31 = vadd.f32 %v1411_v57, %v1297_v53 }
 0x537   : > { %1653 = vst [vmem:[%s2544_s29 + $0x40] sm:$0xff] %v1410_v56 }
 0x538   : > { %1654 = vst [vmem:[%s2544_s29 + $0x48] sm:$0xff] %v1412_v31  ;;  %v1480_v58 = vpop.f32.mrb[6].mxu1 }
 0x539   : > { %v1481_v59 = vadd.f32 %v1480_v58, %v1301_v32  ;;  %v1482_v62 = vpop.f32.mrb[7].mxu1 }
 0x53a   : > { %v1483_v60 = vadd.f32 %v1482_v62, %v1305_v14 }
 0x53b   : > { %1647 = vst [vmem:[%s2544_s29 + $0x10] sm:$0xff] %v1481_v59 }
 0x53c   : > { %1648 = vst [vmem:[%s2544_s29 + $0x18] sm:$0xff] %v1483_v60  ;;  %v1486_v61 = vpop.f32.mrb[8].mxu1 }
 0x53d   : > { %v1487_v10 = vadd.f32 %v1486_v61, %v1301_v32  ;;  %v1488_v63 = vpop.f32.mrb[9].mxu1 }
 0x53e   : > { %v1489_v45 = vadd.f32 %v1488_v63, %v1305_v14 }
 0x53f   : > { %1655 = vst [vmem:[%s2544_s29 + $0x50] sm:$0xff] %v1487_v10 }
 0x540   : > { %1656 = vst [vmem:[%s2544_s29 + $0x58] sm:$0xff] %v1489_v45  ;;  %v1557_v50 = vpop.f32.mrb[10].mxu1 }
 0x541   : > { %v1558_v0 = vadd.f32 %v1557_v50, %v1309_v38  ;;  %v1559_v1 = vpop.f32.mrb[11].mxu1 }
 0x542   : > { %v1560_v19 = vadd.f32 %v1559_v1, %v1313_v39 }
 0x543   : > { %1649 = vst [vmem:[%s2544_s29 + $0x20] sm:$0xff] %v1558_v0 }
 0x544   : > { %1650 = vst [vmem:[%s2544_s29 + $0x28] sm:$0xff] %v1560_v19  ;;  %v1563_v2 = vpop.f32.mrb[12].mxu1 }
 0x545   : > { %v1564_v3 = vadd.f32 %v1563_v2, %v1309_v38  ;;  %v1565_v43 = vpop.f32.mrb[13].mxu1 }
 0x546   : > { %v1566_v16 = vadd.f32 %v1565_v43, %v1313_v39 }
 0x547   : > { %1657 = vst [vmem:[%s2544_s29 + $0x60] sm:$0xff] %v1564_v3 }
 0x548   : > { %1658 = vst [vmem:[%s2544_s29 + $0x68] sm:$0xff] %v1566_v16  ;;  %v1634_v27 = vpop.f32.mrb[14].mxu1 }
 0x549   : > { %v1635_v5 = vadd.f32 %v1634_v27, %v1317_v4  ;;  %v1636_v23 = vpop.f32.mrb[15].mxu1 }
 0x54a   : > { %v1637_v24 = vadd.f32 %v1636_v23, %v1321_v46 }
 0x54b   : > { %1651 = vst [vmem:[%s2544_s29 + $0x30] sm:$0xff] %v1635_v5 }
 0x54c   : > { %1652 = vst [vmem:[%s2544_s29 + $0x38] sm:$0xff] %v1637_v24  ;;  %v1640_v13 = vpop.f32.mrb[16].mxu1 }
 0x54d   : > { %v1641_v25 = vadd.f32 %v1640_v13, %v1317_v4  ;;  %v1642_v49 = vpop.f32.mrb[17].mxu1 }
 0x54e   : > { %v1643_v22 = vadd.f32 %v1642_v49, %v1321_v46 }
 0x54f   : > { %1659 = vst [vmem:[%s2544_s29 + $0x70] sm:$0xff] %v1641_v25 }
 0x550   : > { %1660 = vst [vmem:[%s2544_s29 + $0x78] sm:$0xff] %v1643_v22 }
 0x551   : > { %1976 = shalt.err (!%p1973_p4)
}
 0x552   : > { %s1977_s25 = scalar_lea.hbm %s2571_s22, 2048  ;;  %s1981_s14 = scalar_lea.hbm %s2629_s9, 8192 }
 0x553   : > { %p1978_p7 = scmp.ne.s32.totalorder %s2571_s22, %s1977_s25  ;;  %p1982_p10 = scmp.lt.u32.totalorder %s2571_s22, %s2629_s9 }
 0x554   : > { %p1983_p11 = scmp.lt.u32.totalorder %s1981_s14, %s1977_s25  ;;  %p1985_p13 = scmp.lt.u32.totalorder %s1977_s25, %s2571_s22 }
 0x555   : > { %p1979_p8 = pnand %p1978_p7, %p2119_p5 }
 0x556   : > { %p1984_p12 = por %p1983_p11, %p1982_p10 }
 0x557   : > { %p1980_p9 = pneg %p1979_p8 }
 0x558   : > { %p1986_p0 = por %p1985_p13, %p1984_p12 }
 0x55a   : > { %p1987_p1 = pnand %p1986_p0, %p1980_p9 }
 0x55c   : > { %1990 = shalt.err (!%p1987_p1)
}
 0x55d   : > { %s2029_s23 = smov 1024   ;;  %s2030_s24 = smov 64  }
 0x55e   : > { %1913 = dma.vmem_to_hbm [thread:$0]  (%p2119_p5), %s2573_s16, 2048, %s2571_s22, %s2579_s13, %s2029_s23, %s2029_s23, %s2030_s24  }
 0x55f PF: > { %p1919_p2 = scmp.ge.s32.totalorder %s2025_s12, 2  ;;  %s1691_s26 = sand.u32 1, %s2013_s30  }
 0x560   : > { %s1692_s27 = scalar_lea.sflag [#allocation3], %s1691_s26 }
 0x561   : > { %p1916_p3 = pnand %p1919_p2, %p2123_p6 }
 0x563   : > { %2008 = dma.done.wait (!%p1916_p3), %s1692_s27, 2048  }
 0x564   : > { %2010 = vsyncadd (!%p1916_p3), %s1692_s27, 4294965248  ;;  %p19_p4 = scmp.ge.s32.totalorder %s2106_s15, 6   ;;  %s2632_s30 = smov %s2017_s10 }
 0x565   : > { %s2633_s10 = smov %s2021_s11  ;;  %s2634_s11 = smov %s2117_s18 }
 0x566   : > { %s2635_s12 = smov %s2106_s15  ;;  %21 = sbr.rel (!%p19_p4) target bundleno = 3 (0x3), region = 94 }
 0x56d   :  { %1697 = vsyncpa [#allocation3], 1 }
 0x56e   :  { %1699 = vsyncpa [#allocation3 + $0x1], 1 }

</bundles_post_ra>
